<compile_context>
chip_gen: v7x
topology: tpu7x:2x2x1
jax: 0.10.0
libtpu: 0.0.40
codegen_flags: <defaults>
</compile_context>

<pallas_src>
import jax
import jax.numpy as jnp
from jax.experimental import pallas as pl
from jax.experimental.pallas import tpu as pltpu  # noqa: F401  (toolkit import)

HIDDEN = 32  # hidden width of fc1..fc3 / fc4 input


def mlp_kernel(x_ref, w_ref, b_ref, o_ref):
    # x_ref: (B, 32)      input padded with a ones column (layer-1 bias fold)
    # w_ref: (32, 128)    [W1p | W2 | W3 | W4p] packed along the lane axis
    # b_ref: (1, 128)     [b2 | b3 | b4p | 0 ] packed along the lane axis
    # o_ref: (B, 32)      layer-4 output, lane-padded to 32 (cols >= out_size are 0)
    h = x_ref[...]

    # Layer 1: bias already folded into the weight slab via the ones column.
    h = jnp.maximum(
        jnp.dot(h, w_ref[:, 0 * HIDDEN:1 * HIDDEN],
                preferred_element_type=jnp.float32), 0.0)
    # Layer 2.
    h = jnp.maximum(
        jnp.dot(h, w_ref[:, 1 * HIDDEN:2 * HIDDEN],
                preferred_element_type=jnp.float32)
        + b_ref[:, 0 * HIDDEN:1 * HIDDEN], 0.0)
    # Layer 3.
    h = jnp.maximum(
        jnp.dot(h, w_ref[:, 2 * HIDDEN:3 * HIDDEN],
                preferred_element_type=jnp.float32)
        + b_ref[:, 1 * HIDDEN:2 * HIDDEN], 0.0)
    # Layer 4 (no ReLU).
    h = (jnp.dot(h, w_ref[:, 3 * HIDDEN:4 * HIDDEN],
                 preferred_element_type=jnp.float32)
         + b_ref[:, 2 * HIDDEN:3 * HIDDEN])

    o_ref[...] = h.astype(o_ref.dtype)


def pack_params(params, input_size):
    """Pack [(W1,b1),(W2,b2),(W3,b3),(W4,b4)] into two lane-dense slabs.

    W_i is (in_i, out_i) with y = x @ W + b (i.e. PyTorch weight transposed).
    Returns (w_slab (32,128), b_slab (1,128), out_size).
    """
    (w1, b1), (w2, b2), (w3, b3), (w4, b4) = params
    out_size = w4.shape[1]
    assert input_size < HIDDEN, "layer-1 bias fold needs input_size < 32"
    assert out_size <= HIDDEN

    # W1: (input_size,32) -> (32,32); row `input_size` carries b1 (ones-column fold).
    w1p = jnp.zeros((HIDDEN, HIDDEN), jnp.float32)
    w1p = w1p.at[:input_size, :].set(w1)
    w1p = w1p.at[input_size, :].set(b1.reshape(-1))

    # W4: (32, out_size) -> (32, 32), zero-padded on the lane axis.
    w4p = jnp.zeros((HIDDEN, HIDDEN), jnp.float32)
    w4p = w4p.at[:, :out_size].set(w4)

    w_slab = jnp.concatenate([w1p, w2, w3, w4p], axis=1)          # (32, 128)

    b4p = jnp.zeros((1, HIDDEN), jnp.float32).at[:, :out_size].set(b4.reshape(1, -1))
    b_slab = jnp.concatenate(
        [b2.reshape(1, -1), b3.reshape(1, -1), b4p,
         jnp.zeros((1, HIDDEN), jnp.float32)], axis=1)            # (1, 128)

    return w_slab, b_slab, out_size


def mlp_forward(x, w_slab, b_slab, out_size):
    batch, input_size = x.shape

    # Pad x to 32 lanes: [x | 1 | 0...0]; the ones column applies b1 inside W1p.
    x_pad = jnp.zeros((batch, HIDDEN), jnp.float32)
    x_pad = x_pad.at[:, :input_size].set(x)
    x_pad = x_pad.at[:, input_size].set(1.0)

    out_pad = pl.pallas_call(
        mlp_kernel,
        out_shape=jax.ShapeDtypeStruct((batch, HIDDEN), jnp.float32),
        grid=(),
        in_specs=[
            pl.BlockSpec(x_pad.shape, lambda: (0, 0)),
            pl.BlockSpec(w_slab.shape, lambda: (0, 0)),
            pl.BlockSpec(b_slab.shape, lambda: (0, 0)),
        ],
        out_specs=pl.BlockSpec((batch, HIDDEN), lambda: (0, 0)),
    )(x_pad, w_slab, b_slab)

    return out_pad[:, :out_size]


def init_linear(key, in_features, out_features):
    """Deterministic PyTorch-style uniform init; W returned as (in, out)."""
    kw, kb = jax.random.split(key)
    bound = 1.0 / jnp.sqrt(in_features)
    w = jax.random.uniform(kw, (in_features, out_features), jnp.float32,
                           minval=-bound, maxval=bound)
    b = jax.random.uniform(kb, (1, out_features), jnp.float32,
                           minval=-bound, maxval=bound)
    return w, b


if __name__ == "__main__":
    input_size = 16
    output_size = 8
    batch = 8

    key = jax.random.PRNGKey(0)
    k_x, k1, k2, k3, k4 = jax.random.split(key, 5)

    x = jax.random.normal(k_x, (batch, input_size), dtype=jnp.float32)

    params = [
        init_linear(k1, input_size, 32),
        init_linear(k2, 32, 32),
        init_linear(k3, 32, 32),
        init_linear(k4, 32, output_size),
    ]

    w_slab, b_slab, out_size = pack_params(params, input_size)

    out = mlp_forward(x, w_slab, b_slab, out_size)
    jax.block_until_ready(out)

    # Reference check in plain JAX (same math as the PyTorch forward).
    ref = x
    for i, (w, b) in enumerate(params):
        ref = ref @ w + b
        if i < 3:
            ref = jnp.maximum(ref, 0.0)

    assert out.shape == (batch, output_size)
    assert jnp.allclose(out, ref, atol=1e-5, rtol=1e-5)

    print("KERNEL_OK")
</pallas_src>

<mosaic_0001>
module attributes {stable_mosaic.version = 11 : i64} {
  func.func @mlp_kernel(%arg0: memref<8x32xf32, #tpu.memory_space<vmem>>, %arg1: memref<32x128xf32, #tpu.memory_space<vmem>>, %arg2: memref<1x128xf32, #tpu.memory_space<vmem>>, %arg3: memref<8x32xf32, #tpu.memory_space<vmem>>) attributes {dimension_semantics = [], scalar_prefetch = 0 : i64, scratch_operands = 0 : i64, tpu.core_type = #tpu.core_type<tc>} {
    %c0 = arith.constant 0 : index
    %c0_0 = arith.constant 0 : index
    %0 = vector.load %arg0[%c0, %c0_0] : memref<8x32xf32, #tpu.memory_space<vmem>>, vector<8x32xf32>
    %c0_1 = arith.constant 0 : index
    %c0_2 = arith.constant 0 : index
    %1 = vector.load %arg1[%c0_1, %c0_2] : memref<32x128xf32, #tpu.memory_space<vmem>>, vector<32x32xf32>
    %cst = arith.constant dense<0.000000e+00> : vector<8x32xf32>
    %2 = tpu.matmul %0, %1, %cst {dimension_numbers = #tpu.dot_dimension_numbers<[1], [0], [0], [1], [0, 0, 1, 1], [], []>} : vector<8x32xf32>, vector<32x32xf32>, vector<8x32xf32> -> vector<8x32xf32>
    %cst_3 = arith.constant 0.000000e+00 : f32
    %3 = vector.broadcast %cst_3 : f32 to vector<8x32xf32>
    %4 = arith.maximumf %2, %3 : vector<8x32xf32>
    %c0_4 = arith.constant 0 : index
    %c32 = arith.constant 32 : index
    %5 = vector.load %arg1[%c0_4, %c32] : memref<32x128xf32, #tpu.memory_space<vmem>>, vector<32x32xf32>
    %cst_5 = arith.constant dense<0.000000e+00> : vector<8x32xf32>
    %6 = tpu.matmul %4, %5, %cst_5 {dimension_numbers = #tpu.dot_dimension_numbers<[1], [0], [0], [1], [0, 0, 1, 1], [], []>} : vector<8x32xf32>, vector<32x32xf32>, vector<8x32xf32> -> vector<8x32xf32>
    %c0_6 = arith.constant 0 : index
    %c0_7 = arith.constant 0 : index
    %7 = vector.load %arg2[%c0_6, %c0_7] : memref<1x128xf32, #tpu.memory_space<vmem>>, vector<1x32xf32>
    %8 = vector.broadcast %7 : vector<1x32xf32> to vector<8x32xf32>
    %9 = arith.addf %6, %8 : vector<8x32xf32>
    %cst_8 = arith.constant 0.000000e+00 : f32
    %10 = vector.broadcast %cst_8 : f32 to vector<8x32xf32>
    %11 = arith.maximumf %9, %10 : vector<8x32xf32>
    %c0_9 = arith.constant 0 : index
    %c64 = arith.constant 64 : index
    %12 = vector.load %arg1[%c0_9, %c64] : memref<32x128xf32, #tpu.memory_space<vmem>>, vector<32x32xf32>
    %cst_10 = arith.constant dense<0.000000e+00> : vector<8x32xf32>
    %13 = tpu.matmul %11, %12, %cst_10 {dimension_numbers = #tpu.dot_dimension_numbers<[1], [0], [0], [1], [0, 0, 1, 1], [], []>} : vector<8x32xf32>, vector<32x32xf32>, vector<8x32xf32> -> vector<8x32xf32>
    %c0_11 = arith.constant 0 : index
    %c32_12 = arith.constant 32 : index
    %14 = vector.load %arg2[%c0_11, %c32_12] : memref<1x128xf32, #tpu.memory_space<vmem>>, vector<1x32xf32>
    %15 = vector.broadcast %14 : vector<1x32xf32> to vector<8x32xf32>
    %16 = arith.addf %13, %15 : vector<8x32xf32>
    %cst_13 = arith.constant 0.000000e+00 : f32
    %17 = vector.broadcast %cst_13 : f32 to vector<8x32xf32>
    %18 = arith.maximumf %16, %17 : vector<8x32xf32>
    %c0_14 = arith.constant 0 : index
    %c96 = arith.constant 96 : index
    %19 = vector.load %arg1[%c0_14, %c96] : memref<32x128xf32, #tpu.memory_space<vmem>>, vector<32x32xf32>
    %cst_15 = arith.constant dense<0.000000e+00> : vector<8x32xf32>
    %20 = tpu.matmul %18, %19, %cst_15 {dimension_numbers = #tpu.dot_dimension_numbers<[1], [0], [0], [1], [0, 0, 1, 1], [], []>} : vector<8x32xf32>, vector<32x32xf32>, vector<8x32xf32> -> vector<8x32xf32>
    %c0_16 = arith.constant 0 : index
    %c64_17 = arith.constant 64 : index
    %21 = vector.load %arg2[%c0_16, %c64_17] : memref<1x128xf32, #tpu.memory_space<vmem>>, vector<1x32xf32>
    %22 = vector.broadcast %21 : vector<1x32xf32> to vector<8x32xf32>
    %23 = arith.addf %20, %22 : vector<8x32xf32>
    %c0_18 = arith.constant 0 : index
    %c0_19 = arith.constant 0 : index
    %24 = vector.load %arg3[%c0_18, %c0_19] : memref<8x32xf32, #tpu.memory_space<vmem>>, vector<8x32xf32>
    tpu.vector_store %arg3[%c0_18, %c0_19], %23 {strides = array<i32>} : memref<8x32xf32, #tpu.memory_space<vmem>>, vector<8x32xf32>,
    return
  }
}

</mosaic_0001>

<bundles_post_ra>
// kernel: tpu_custom_call.1
= control target key start
LH: loop header
LB: loop body
LE: loop exit
PB: predicated region body
PF: predicated region fallthrough
CT: control target
= control target key end

     0   :  { %8 = vsyncpa [#allocation3], 0  ;;  %s718_s0 = inlined_call_operand.hbm [shape: f32[8,32], index: 0, kind: input, shape index: {}]   ;;  %s719_s1 = inlined_call_operand.hbm [shape: f32[32,128], index: 1, kind: input, shape index: {}]   ;;  %s720_s2 = inlined_call_operand.vmem [shape: f32[1,128], index: 2, kind: input, shape index: {}]   ;;  %s721_s3 = inlined_call_operand.hbm [shape: f32[8,32], index: 3, kind: output, shape index: {}]  }
   0x1   :  { %9 = vsyncpa [#allocation6], 0 }
   0x2   :  { %10 = vsyncpa [#allocation4], 0  ;;  %s618_s12 = smov [#allocation2]   ;;  %s619_s14 = smov [#allocation5]  }
   0x3   :  { %s17_s13 = sshll.u32 %s618_s12, 4  ;;  %s26_s15 = sshll.u32 %s619_s14, 4  ;;  %s18_s13 = int_to_ptr.vmem [resolvable:$true] %s17_s13  ;;  %s649_s15 = int_to_ptr.vmem [resolvable:$true] %s26_s15 }
   0x4   :  { %s546_s18 = scalar_lea.hbm %s718_s0, 128 }
   0x5   :  { %p547_p0 = scmp.ne.s32.totalorder %s718_s0, %s546_s18  ;;  %p550_p1 = scmp.lt.u32.totalorder %s546_s18, %s718_s0 }
   0x7   :  { %p552_p2 = pnand %p550_p1, %p547_p0 }
   0x9   :  { %555 = shalt.err (!%p552_p2)
}
   0xa   :  { %s556_s23 = scalar_lea.vmem %s18_s13, 128  ;;  %p561_p4 = scmp.lt.s32.totalorder %s18_s13, %s18_s13 }
   0xb   :  { %p557_p3 = scmp.ne.s32.totalorder %s18_s13, %s556_s23  ;;  %p562_p5 = scmp.lt.s32.totalorder %s556_s23, %s556_s23 }
   0xd   :  { %p563_p6 = por %p562_p5, %p561_p4 }
   0xf   :  { %p564_p7 = pnand %p563_p6, %p557_p3 }
  0x11   :  { %567 = shalt.err (!%p564_p7)
}
  0x12   :  { %20 = dma.hbm_to_vmem [thread:$0]  %s718_s0, 128, %s18_s13, [#allocation3]  }
  0x13   :  { %s568_s28 = scalar_lea.hbm %s719_s1, 512 }
  0x14   :  { %p569_p8 = scmp.ne.s32.totalorder %s719_s1, %s568_s28  ;;  %p572_p9 = scmp.lt.u32.totalorder %s568_s28, %s719_s1 }
  0x16   :  { %p574_p10 = pnand %p572_p9, %p569_p8 }
  0x18   :  { %577 = shalt.err (!%p574_p10)
}
  0x19   :  { %s578_s6 = scalar_lea.vmem %s649_s15, 512  ;;  %p583_p12 = scmp.lt.s32.totalorder %s649_s15, %s649_s15 }
  0x1a   :  { %p579_p11 = scmp.ne.s32.totalorder %s649_s15, %s578_s6  ;;  %p584_p13 = scmp.lt.s32.totalorder %s578_s6, %s578_s6 }
  0x1c   :  { %p585_p0 = por %p584_p13, %p583_p12 }
  0x1e   :  { %p586_p1 = pnand %p585_p0, %p579_p11 }
  0x20   :  { %589 = shalt.err (!%p586_p1)
}
  0x21   :  { %s620_s0 = smov 128   ;;  %s621_s7 = smov 8  }
  0x22   :  { %32 = dma.hbm_to_vmem [thread:$0]  %s719_s1, 512, %s649_s15, [#allocation6], %s620_s0, %s620_s0, %s621_s7  }
  0x23   :  { %612 = dma.done.wait [#allocation3], 128  }
  0x24   :  { %613 = vsyncadd [#allocation3], 4294967168 }
  0x25   :  { %614 = dma.done.wait [#allocation6], 512  }
  0x26   :  { %615 = vsyncadd [#allocation6], 4294966784  ;;  %v622_v0 = vmov 0.0|0.0   ;;  %vm623_vm0 = vmmov 0   ;;  %v624_v1 = vmov 0.0   ;;  %v42_v2 = vld [vmem:[#allocation5] sm:$0xff] }
  0x27   :  { %481 = vmatprep.subr.bf16.mxu0 %v622_v0  ;;  %445 = vmatprep.mubr.msk.f32.mxu0 %vm623_vm0, %v624_v1  ;;  %v43_v3 = vld [vmem:[#allocation5 + $0x8] sm:$0xff]  ;;  %v44_v4 = vld [vmem:[#allocation5 + $0x10] sm:$0xff]  ;;  %v45_v6 = vld [vmem:[#allocation5 + $0x18] sm:$0xff]  ;;  %s625_s1 = smov 96   ;;  %vm46_vm1 = vcmask 261120   ;;  %s626_s10 = smov 64  }
  0x28   :  { %487 = vmatprep.subr.bf16.mxu1 %v622_v0  ;;  %456 = vmatprep.mubr.msk.f32.mxu1 %vm623_vm0, %v624_v1  ;;  %v482_v5 = vpack.c.bf16 %v43_v3, %v42_v2  ;;  %v516_v7 = vpack.i.bf16 %v43_v3, %v42_v2  ;;  %v485_v8 = vpack.c.bf16 %v45_v6, %v44_v4  ;;  %v41_v10 = vld [vmem:[#allocation2] sm:$0xff]  ;;  %s627_s11 = smov 32  }
  0x29   :  { %v521_v9 = vpack.i.bf16 %v45_v6, %v44_v4  ;;  %v413_v30 = vld [vmem:[%s720_s2] ss:$0 sm:$0xff]  ;;  %s628_s2 = smov [#allocation7]  }
  0x2a   :  { %483 = vmatpush3.bf16.msra.mxu0 %v482_v5  ;;  %517 = vrot.lane.b32.xlu0 %v516_v7, %s625_s1  ;;  %s402_s14 = sshll.u32 %s628_s2, 4  ;;  %s403_s14 = int_to_ptr.vmem [resolvable:$true] %s402_s14 }
  0x2b   :  { %484 = vmatprep.subr.bf16.mxu0 %v622_v0  ;;  %527 = vrot.lane.b32.xlu1 %v516_v7, %s626_s10  ;;  %s590_s15 = scalar_lea.vmem %s403_s14, 128  ;;  %p595_p3 = scmp.lt.s32.totalorder %s403_s14, %s403_s14 }
  0x2c   :  { %p591_p2 = scmp.ne.s32.totalorder %s403_s14, %s590_s15  ;;  %p596_p4 = scmp.lt.s32.totalorder %s590_s15, %s590_s15 }
  0x2e   :  { %486 = vmatpush3.bf16.msra.mxu0 %v485_v8  ;;  %522 = vrot.lane.b32.xlu0 %v521_v9, %s625_s1  ;;  %p597_p5 = por %p596_p4, %p595_p3 }
  0x2f   :  { %493 = vmatprep.subr.bf16.mxu0 %v622_v0  ;;  %532 = vrot.lane.b32.xlu1 %v521_v9, %s626_s10 }
  0x30   :  { %p598_p6 = pnand %p597_p5, %p591_p2 }
  0x31   :  { %446 = vmatmul.mubr.msk.f32.vlgmr.msra.gmra.mrb[0].mxu0 %vm46_vm1, %v41_v10 }
  0x32   :  { %467 = vmatprep.mubr.msk.f32.mxu0 %vm623_vm0, %v624_v1  ;;  %537 = vrot.lane.b32.xlu0 %v516_v7, %s627_s11 }
  0x33   :  { %542 = vrot.lane.b32.xlu1 %v521_v9, %s627_s11 }
  0x36   :  { %230 = vrot.lane.b32.xlu0 %v413_v30, %s625_s1 }
  0x37   :  { %319 = vrot.lane.b32.xlu1 %v413_v30, %s626_s10 }
  0x9c   :  { %v518_v11 = vpop.permute.xlu0 %517 }
  0x9d   :  { %v520_v12 = vunpack.i.h.bf16 %v518_v11  ;;  %v519_v13 = vunpack.i.l.bf16 %v518_v11  ;;  %v528_v19 = vpop.permute.xlu1 %527 }
  0x9e   :  { %v530_v20 = vunpack.i.h.bf16 %v528_v19  ;;  %v529_v21 = vunpack.i.l.bf16 %v528_v19 }
  0x9f   :  { %v488_v14 = vpack.c.bf16 %v520_v12, %v519_v13 }
  0xa0   :  { %v523_v15 = vpop.permute.xlu0 %522  ;;  %v494_v22 = vpack.c.bf16 %v530_v20, %v529_v21 }
  0xa1   :  { %v525_v16 = vunpack.i.h.bf16 %v523_v15  ;;  %v524_v17 = vunpack.i.l.bf16 %v523_v15  ;;  %489 = vmatpush3.bf16.msra.mxu1 %v488_v14  ;;  %v533_v23 = vpop.permute.xlu1 %532 }
  0xa2   :  { %490 = vmatprep.subr.bf16.mxu1 %v622_v0  ;;  %v535_v24 = vunpack.i.h.bf16 %v533_v23  ;;  %v534_v25 = vunpack.i.l.bf16 %v533_v23  ;;  %495 = vmatpush3.bf16.msra.mxu0 %v494_v22 }
  0xa3   :  { %v491_v18 = vpack.c.bf16 %v525_v16, %v524_v17  ;;  %496 = vmatprep.subr.bf16.mxu0 %v622_v0 }
  0xa4   :  { %v497_v26 = vpack.c.bf16 %v535_v24, %v534_v25  ;;  %v538_v31 = vpop.permute.xlu0 %537 }
  0xa5   :  { %492 = vmatpush3.bf16.msra.mxu1 %v491_v18  ;;  %v543_v32 = vpop.permute.xlu1 %542  ;;  %v540_v33 = vunpack.i.h.bf16 %v538_v31  ;;  %v539_v34 = vunpack.i.l.bf16 %v538_v31 }
  0xa6   :  { %499 = vmatprep.subr.bf16.mxu1 %v622_v0  ;;  %498 = vmatpush3.bf16.msra.mxu0 %v497_v26  ;;  %v545_v35 = vunpack.i.h.bf16 %v543_v32  ;;  %v544_v36 = vunpack.i.l.bf16 %v543_v32 }
  0xa7   :  { %v500_v37 = vpack.c.bf16 %v540_v33, %v539_v34 }
  0xa8   :  { %v503_v38 = vpack.c.bf16 %v545_v35, %v544_v36  ;;  %v231_v43 = vpop.permute.xlu0 %230 }
  0xa9   :  { %v320_v48 = vpop.permute.xlu1 %319 }
 0x104   :  { %v116_v27 = vpop.f32.mrb[0].mxu0 }
 0x105   :  { %v120_v28 = vmax.f32 %v116_v27, 0.0  ;;  %v447_v29 = vpop.f32.mrb[1].mxu0 }
 0x107   :  { %457 = vmatmul.mubr.msk.f32.vlgmr.msra.gmra.mrb[0].mxu1 %vm46_vm1, %v120_v28 }
 0x108   :  { %478 = vmatprep.mubr.msk.f32.mxu1 %vm623_vm0, %v624_v1  ;;  %501 = vmatpush3.bf16.msra.mxu1 %v500_v37 }
 0x109   :  { %502 = vmatprep.subr.bf16.mxu1 %v622_v0 }
 0x10c   :  { %504 = vmatpush3.bf16.msra.mxu1 %v503_v38 }
 0x1da   :  { %v213_v39 = vpop.f32.mrb[0].mxu1 }
 0x1db   :  { %v214_v40 = vadd.f32 %v413_v30, %v213_v39  ;;  %v458_v41 = vpop.f32.mrb[1].mxu1 }
 0x1dd   :  { %v217_v42 = vmax.f32 %v214_v40, 0.0 }
 0x1df   :  { %468 = vmatmul.mubr.msk.f32.vlgmr.msra.gmra.mrb[2].mxu0 %vm46_vm1, %v217_v42 }
 0x2b2   :  { %v302_v44 = vpop.f32.mrb[2].mxu0 }
 0x2b3   :  { %v303_v45 = vadd.f32 %v302_v44, %v231_v43  ;;  %v469_v46 = vpop.f32.mrb[3].mxu0 }
 0x2b5   :  { %v306_v47 = vmax.f32 %v303_v45, 0.0 }
 0x2b7   :  { %479 = vmatmul.mubr.msk.f32.vlgmr.msra.gmra.mrb[2].mxu1 %vm46_vm1, %v306_v47 }
 0x38a   :  { %v391_v49 = vpop.f32.mrb[2].mxu1 }
 0x38b   :  { %v392_v50 = vadd.f32 %v391_v49, %v320_v48  ;;  %v480_v51 = vpop.f32.mrb[3].mxu1 }
 0x38d   :  { %395 = vst.msk [vmem:[#allocation7] sm:$0xff] %vm46_vm1, %v392_v50 }
 0x38e   :  { %601 = shalt.err (!%p598_p6)
}
 0x38f   :  { %s602_s18 = scalar_lea.hbm %s721_s3, 128 }
 0x390   :  { %p603_p7 = scmp.ne.s32.totalorder %s721_s3, %s602_s18  ;;  %p606_p8 = scmp.lt.u32.totalorder %s602_s18, %s721_s3 }
 0x392   :  { %p608_p9 = pnand %p606_p8, %p603_p7 }
 0x394   :  { %611 = shalt.err (!%p608_p9)
}
 0x395   :  { %405 = dma.vmem_to_hbm [thread:$0]  %s403_s14, 128, %s721_s3, [#allocation4]  }
 0x396   :  { %616 = dma.done.wait [#allocation4], 128  }
 0x397   :  { %617 = vsyncadd [#allocation4], 4294967168 }
 0x398   :  { %409 = vsyncpa [#allocation3], 1 }
 0x399   :  { %410 = vsyncpa [#allocation6], 1 }
 0x39a   :  { %411 = vsyncpa [#allocation4], 1 }

</bundles_post_ra>
